<compile_context>
chip_gen: v7x
topology: tpu7x:2x2x1
jax: 0.10.0
libtpu: 0.0.40
codegen_flags: <defaults>
</compile_context>

<pallas_src>
import jax
import jax.numpy as jnp
from jax.experimental import pallas as pl
from jax.experimental.pallas import tpu as pltpu


# Conservative cross-generation VMEM sizing:
#   v7x has only 64 MiB physical VMEM per TensorCore, so budget the
#   double-buffered working set to ~36 MiB and request a 48 MiB scoped limit
#   (also fine on v5e/v6e, which have 128 MiB physical but 16/32 MiB defaults).
_VMEM_TILE_BUDGET = 36 * 1024 * 1024
_VMEM_LIMIT_BYTES = 48 * 1024 * 1024
_TARGET_STEP_BYTES = 4 * 1024 * 1024   # aim for >= ~4 MB of HBM traffic per grid step


def _cdiv(a, b):
    return (a + b - 1) // b


def _choose_tiles(N, C_in, C_out, HW, itemsize):
    """Pick (batch tile Nb, spatial tile t_hw) from the VMEM budget."""
    chan = C_in + C_out
    # Spatial tile: as large as the double-buffered x+out working set allows.
    cap_cols = _VMEM_TILE_BUDGET // (2 * chan * itemsize)
    if cap_cols >= HW:
        t_hw = HW                                   # full extent: always legal
    else:
        t_hw = max(128, (cap_cols // 128) * 128)    # lane dim multiple of 128
    n_sp = _cdiv(HW, t_hw)

    # Batch tile: only useful when one spatial tile already covers H*W
    # (small feature maps) and each step would otherwise be tiny.
    nb = 1
    if n_sp == 1 and N > 1:
        per_img_bytes = chan * t_hw * itemsize
        nb_cap = min(
            N,
            max(1, _VMEM_TILE_BUDGET // (2 * per_img_bytes)),   # VMEM fit
            max(1, _TARGET_STEP_BYTES // per_img_bytes),        # enough per-step work
            max(1, N // 2),                                     # keep >=2 steps (v7x megacore)
        )
        # Largest divisor of N that is <= nb_cap (avoids ragged batch blocks).
        nb = max(d for d in range(1, nb_cap + 1) if N % d == 0)
    return nb, t_hw


def _shrink_prelu_kernel(x_ref, w_ref, b_ref, a_ref, o_ref):
    # x_ref: (Nb, C_in, t_hw)  activations, spatial on lanes (I/O dtype)
    # w_ref: (C_out, C_in)     1x1-conv weight, f32, resident across the grid
    # b_ref: (C_out, 1)        conv bias, f32, resident (broadcasts over lanes)
    # a_ref: (1,) f32 SMEM     PReLU slope (nn.PReLU() default: one shared param)
    # o_ref: (Nb, C_out, t_hw) lane-dense output tile
    alpha = a_ref[0]
    w = w_ref[...]
    b = b_ref[...]
    for i in range(x_ref.shape[0]):                     # static unroll; Nb is small
        y = jnp.dot(w, x_ref[i].astype(jnp.float32),
                    preferred_element_type=jnp.float32)  # (C_out, t_hw) on the MXU
        y = y + b                                        # (C_out, 1) broadcasts over lanes
        o_ref[i] = jnp.where(y > 0, y, alpha * y).astype(o_ref.dtype)


def shrinking_forward(x_nchw, weight, bias, prelu_alpha, *, io_dtype=None):
    """Forward of `schrinking`: PReLU(Conv2d(C_in->C_out, k=1, bias=True)(x)).

    x_nchw: (N, C_in, H, W); weight: (C_out, C_in) or (C_out, C_in, 1, 1);
    bias: (C_out,); prelu_alpha: scalar.
    io_dtype: optional activation/output dtype (e.g. jnp.bfloat16) to halve HBM
    traffic on this bandwidth-bound kernel; weights stay f32 either way.
    Returns (N, C_out, H, W) in the activation dtype.
    """
    N, C_in, H, W = x_nchw.shape
    weight = jnp.asarray(weight).reshape(weight.shape[0], -1)   # squeeze 1x1 taps if 4-D
    C_out = weight.shape[0]
    HW = H * W

    if io_dtype is not None:
        x_nchw = x_nchw.astype(io_dtype)
    out_dtype = x_nchw.dtype
    itemsize = jnp.dtype(out_dtype).itemsize

    # Free reshape only (stays NCHW, no transposes): (N, C_in, H*W).
    x3 = x_nchw.reshape(N, C_in, HW)

    nb, t_hw = _choose_tiles(N, C_in, C_out, HW, itemsize)
    grid = (N // nb, _cdiv(HW, t_hw))               # ragged last spatial tile is masked

    w_mat = weight.astype(jnp.float32)              # tiny + resident: keep full precision
    b_col = jnp.asarray(bias, jnp.float32).reshape(C_out, 1)
    a_smem = jnp.asarray(prelu_alpha, jnp.float32).reshape(1)

    out3 = pl.pallas_call(
        _shrink_prelu_kernel,
        out_shape=jax.ShapeDtypeStruct((N, C_out, HW), out_dtype),
        grid_spec=pltpu.PrefetchScalarGridSpec(
            num_scalar_prefetch=0,
            grid=grid,
            in_specs=[
                pl.BlockSpec((nb, C_in, t_hw), lambda n, t: (n, 0, t)),     # x tile
                pl.BlockSpec((C_out, C_in), lambda n, t: (0, 0)),           # weight (resident)
                pl.BlockSpec((C_out, 1), lambda n, t: (0, 0)),              # bias (resident)
                pl.BlockSpec(memory_space=pltpu.MemorySpace.SMEM),          # PReLU alpha
            ],
            out_specs=pl.BlockSpec((nb, C_out, t_hw), lambda n, t: (n, 0, t)),
        ),
        compiler_params=pltpu.CompilerParams(
            dimension_semantics=("parallel", "parallel"),
            vmem_limit_bytes=_VMEM_LIMIT_BYTES,
        ),
    )(x3, w_mat, b_col, a_smem)

    return out3.reshape(N, C_out, H, W)


def init_params(key, out1, out2):
    """Deterministic init matching the module shapes:
       Conv2d(out1, out2, k=1, bias=True) -> weight (out2, out1), bias (out2,)
       nn.PReLU() -> single slope, default 0.25."""
    kw, kb = jax.random.split(key)
    fan_in = out1 * 1 * 1
    bound = 1.0 / (fan_in ** 0.5)
    weight = jax.random.uniform(kw, (out2, out1), jnp.float32, -bound, bound)
    bias = jax.random.uniform(kb, (out2,), jnp.float32, -bound, bound)
    prelu_alpha = jnp.float32(0.25)
    return weight, bias, prelu_alpha


if __name__ == "__main__":
    key = jax.random.PRNGKey(0)
    k_x, k_p = jax.random.split(key)

    # small shapes consistent with the module: batch=2, out1=4 in-channels,
    # out2=8 out-channels, spatial 16x16
    N, C_in, C_out, H, W = 2, 4, 8, 16, 16
    x = jax.random.normal(k_x, (N, C_in, H, W), jnp.float32)

    weight, bias, alpha = init_params(k_p, C_in, C_out)

    out = shrinking_forward(x, weight, bias, alpha)
    out = jax.block_until_ready(out)

    # reference in plain JAX (1x1 conv == einsum over channels, then PReLU)
    y_ref = jnp.einsum("nchw,oc->nohw", x, weight) + bias[None, :, None, None]
    y_ref = jnp.where(y_ref > 0, y_ref, alpha * y_ref)
    assert out.shape == (N, C_out, H, W)
    assert jnp.allclose(out, y_ref, atol=1e-4), "mismatch vs reference"

    print("KERNEL_OK")
</pallas_src>

<mosaic_0001>
module attributes {stable_mosaic.version = 11 : i64} {
  func.func @_shrink_prelu_kernel(%arg0: i32, %arg1: i32, %arg2: memref<1x4x256xf32, #tpu.memory_space<vmem>>, %arg3: memref<8x4xf32, #tpu.memory_space<vmem>>, %arg4: memref<8x1xf32, #tpu.memory_space<vmem>>, %arg5: memref<1xf32, #tpu.memory_space<smem>>, %arg6: memref<1x8x256xf32, #tpu.memory_space<vmem>>) attributes {dimension_semantics = [#tpu.dimension_semantics<parallel>, #tpu.dimension_semantics<parallel>], iteration_bounds = array<i64: 2, 1>, scalar_prefetch = 0 : i64, scratch_operands = 0 : i64, tpu.core_type = #tpu.core_type<tc>, window_params = [{transform_indices = @transform_0, window_bounds = array<i64: 1, 4, 256>}, {pipeline_mode = #tpu.pipeline_mode<synchronous>, transform_indices = @transform_1, window_bounds = array<i64: 8, 4>}, {pipeline_mode = #tpu.pipeline_mode<synchronous>, transform_indices = @transform_2, window_bounds = array<i64: 8, 1>}, {transform_indices = @transform_3, window_bounds = array<i64: 1>}, {transform_indices = @transform_4, window_bounds = array<i64: 1, 8, 256>}]} {
    %c0 = arith.constant 0 : index
    %0 = memref.load %arg5[%c0] : memref<1xf32, #tpu.memory_space<smem>>
    %c0_0 = arith.constant 0 : index
    %c0_1 = arith.constant 0 : index
    %1 = vector.load %arg3[%c0_0, %c0_1] : memref<8x4xf32, #tpu.memory_space<vmem>>, vector<8x4xf32>
    %c0_2 = arith.constant 0 : index
    %c0_3 = arith.constant 0 : index
    %2 = vector.load %arg4[%c0_2, %c0_3] : memref<8x1xf32, #tpu.memory_space<vmem>>, vector<8x1xf32>
    %c0_4 = arith.constant 0 : index
    %c0_5 = arith.constant 0 : index
    %c0_6 = arith.constant 0 : index
    %3 = vector.load %arg2[%c0_4, %c0_5, %c0_6] : memref<1x4x256xf32, #tpu.memory_space<vmem>>, vector<1x4x256xf32>
    %4 = vector.shape_cast %3 : vector<1x4x256xf32> to vector<4x256xf32>
    %cst = arith.constant dense<0.000000e+00> : vector<8x256xf32>
    %5 = tpu.matmul %1, %4, %cst {dimension_numbers = #tpu.dot_dimension_numbers<[1], [0], [0], [1], [0, 0, 1, 1], [], []>} : vector<8x4xf32>, vector<4x256xf32>, vector<8x256xf32> -> vector<8x256xf32>
    %6 = vector.broadcast %2 : vector<8x1xf32> to vector<8x256xf32>
    %7 = arith.addf %5, %6 : vector<8x256xf32>
    %cst_7 = arith.constant 0.000000e+00 : f32
    %8 = vector.broadcast %cst_7 : f32 to vector<8x256xf32>
    %9 = arith.cmpf ogt, %7, %8 : vector<8x256xf32>
    %10 = vector.broadcast %0 : f32 to vector<8x256xf32>
    %11 = arith.mulf %10, %7 : vector<8x256xf32>
    %12 = arith.select %9, %7, %11 : vector<8x256xi1>, vector<8x256xf32>
    %c0_8 = arith.constant 0 : index
    %c0_9 = arith.constant 0 : index
    %c0_10 = arith.constant 0 : index
    %13 = vector.load %arg6[%c0_8, %c0_9, %c0_10] : memref<1x8x256xf32, #tpu.memory_space<vmem>>, vector<1x8x256xf32>
    %14 = vector.shape_cast %13 : vector<1x8x256xf32> to vector<8x256xf32>
    %15 = vector.shape_cast %12 : vector<8x256xf32> to vector<1x8x256xf32>
    tpu.vector_store %arg6[%c0_8, %c0_9, %c0_10], %15 {strides = array<i32>} : memref<1x8x256xf32, #tpu.memory_space<vmem>>, vector<1x8x256xf32>,
    return
  }
  func.func @transform_0(%arg0: i32, %arg1: i32) -> (i32, i32, i32) {
    %c0_i32 = arith.constant 0 : i32
    %c0_i32_0 = arith.constant 0 : i32
    return %arg0, %c0_i32, %arg1 : i32, i32, i32
  }
  func.func @transform_1(%arg0: i32, %arg1: i32) -> (i32, i32) {
    %c0_i32 = arith.constant 0 : i32
    %c0_i32_0 = arith.constant 0 : i32
    %c0_i32_1 = arith.constant 0 : i32
    return %c0_i32, %c0_i32_0 : i32, i32
  }
  func.func @transform_2(%arg0: i32, %arg1: i32) -> (i32, i32) {
    %c0_i32 = arith.constant 0 : i32
    %c0_i32_0 = arith.constant 0 : i32
    %c0_i32_1 = arith.constant 0 : i32
    return %c0_i32, %c0_i32_0 : i32, i32
  }
  func.func @transform_3(%arg0: i32, %arg1: i32) -> i32 {
    %c0_i32 = arith.constant 0 : i32
    %c0_i32_0 = arith.constant 0 : i32
    return %c0_i32 : i32
  }
  func.func @transform_4(%arg0: i32, %arg1: i32) -> (i32, i32, i32) {
    %c0_i32 = arith.constant 0 : i32
    %c0_i32_0 = arith.constant 0 : i32
    return %arg0, %c0_i32, %arg1 : i32, i32, i32
  }
}

</mosaic_0001>

<bundles_post_ra>
// kernel: tpu_custom_call.1
= control target key start
LH: loop header
LB: loop body
LE: loop exit
PB: predicated region body
PF: predicated region fallthrough
CT: control target
= control target key end

     0   :  { %s727_s0 = inlined_call_operand.vmem [shape: f32[2,4,256], index: 0, kind: input, shape index: {}]   ;;  %s728_s1 = inlined_call_operand.vmem [shape: f32[8,4], index: 1, kind: input, shape index: {}]   ;;  %s729_s2 = inlined_call_operand.vmem [shape: f32[8,1], index: 2, kind: input, shape index: {}]   ;;  %s730_s3 = inlined_call_operand.<no memory space> [shape: f32[1], index: 3, kind: input, shape index: {}]   ;;  %s731_s4 = inlined_call_operand.hbm [shape: f32[2,8,256], index: 4, kind: output, shape index: {}]  }
   0x1   :  { %9 = sst [smem:[#allocation2]] %s730_s3 }
   0x2   :  { %10 = vsyncpa [#allocation4], 0 }
   0x3   :  { %12 = vsyncpa [#allocation4 + $0x1], 0  ;;  %s609_s17 = smov 0   ;;  %s611_s18 = smov 0  }
   0x4   :  { %s613_s19 = smov 0   ;;  %s615_s20 = smov 0  }
   0x5   :  { %s617_s21 = smov 0   ;;  %s619_s22 = smov 0  }
   0x6 LB: > { %s421_s3 = sadd.s32 4294967295, %s576_s22   ;;  %s422_s23 = sadd.s32 4294967294, %s576_s22   ;;  %s576_s22 = sphi %s619_s22, %s18_s22   ;;  %s572_s21 = sphi %s617_s21, %s738_s21   ;;  %s568_s20 = sphi %s615_s20, %s737_s20   ;;  %s564_s19 = sphi %s613_s19, %s736_s19   ;;  %s560_s18 = sphi %s611_s18, %s735_s18   ;;  %s556_s17 = sphi %s609_s17, %s734_s17  }
   0x7   : > { %s30_s24 = sadd.s32 1, %s572_s21  ;;  %s130_s25 = sadd.s32 1, %s564_s19 }
   0x8   : > { %p32_p0 = scmp.ge.s32.totalorder %s30_s24, 2  ;;  %p140_p1 = scmp.ne.s32.totalorder %s564_s19, %s560_s18 }
   0x9   : > { %p141_p2 = scmp.eq.s32.totalorder %s421_s3, 1  ;;  %p146_p3 = scmp.ne.s32.totalorder %s560_s18, %s556_s17 }
   0xa   : > { %s740_s24 = smov (%p32_p0, %s30_s24), 0  ;;  %p147_p5 = scmp.eq.s32.totalorder %s422_s23, 1 }
   0xb   : > { %p649_p4 = por %p141_p2, %p140_p1  ;;  %s125_s27 = ssub.s32 %s572_s21, %s740_s24 }
   0xc   : > { %p425_p6 = scmp.ge.s32.totalorder %s576_s22, 1  ;;  %p128_p7 = scmp.eq.s32.totalorder %s125_s27, 0 }
   0xd   : > { %p656_p8 = por %p147_p5, %p146_p3  ;;  %p187_p9 = scmp.lt.s32.totalorder %s576_s22, 3 }
   0xe   : > { %s662_s29 = scalar_select %p128_p7, %s564_s19, %s130_s25  }
   0xf   : > { %p188_p10 = pnand %p425_p6, %p187_p9 }
  0x10   : > { %p218_p11 = scmp.lt.s32.totalorder (!%p188_p10), %s568_s20, 1  ;;  %v578_v0 = vmov (!%p188_p10), 0.0   ;;  %v579_v1 = vmov (!%p188_p10), 0   ;;  %v230_v2 = vld [vmem:[%s729_s2] sm:$0xff] (!%p188_p10)  ;;  %vm243_vm0 = vcmask (!%p188_p10), 1043456   ;;  %vm239_vm1 = vcmask (!%p188_p10), 31744  }
  0x11   : > { %191 = sbr.rel (%p188_p10) target bundleno = 265 (0x109), region = 36  ;;  %312 = vmatprep.mubr.f32.mxu0 (!%p188_p10), %v578_v0  ;;  %496 = vset.pattern.permute.xlu0 (!%p188_p10), %v579_v1  ;;  %v229_v5 = vld [vmem:[%s728_s1] sm:$0xff] (!%p188_p10)  ;;  %s228_s13 = sld [smem:[#allocation2]] (!%p188_p10) }
  0x12   : > { %234 = vperm.xlu0 (!%p188_p10), %496, %v230_v2   ;;  %s214_s14 = sand.u32 (!%p188_p10), 1, %s560_s18   ;;  %s438_s16 = sshll.u32 (!%p188_p10), %s568_s20, 8 }
  0x13   : > { %s426_s15 = sshll.u32 (!%p188_p10), %s214_s14, 4  ;;  %s680_s30 = scalar_lea.hbm (!%p188_p10), %s731_s4, %s438_s16 }
  0x14   : > { %s216_s3 = scalar_lea.vmem (!%p188_p10), [#allocation3], %s426_s15 }
  0x15   : > { %s345_s23 = sshll.u32 (!%p188_p10), %s216_s3, 4  ;;  %s682_s23 = int_to_ptr.vmem [resolvable:$true] %s345_s23 }
  0x16   : > { %s498_s5 = scalar_lea.vmem (!%p188_p10), %s682_s23, 256 }
  0x17   : > { %v321_v8 = vstv (!%p188_p10), %s228_s13  ;;  %p499_p12 = scmp.ne.s32.totalorder (!%p188_p10), %s682_s23, %s498_s5 }
  0x18   : > { %s219_s6 = scalar_select %p218_p11, %s568_s20, 1 }
  0x19   : > { %s329_s20 = scalar_lea.sflag [#allocation4], %s214_s14  ;;  %p500_p13 = pnand %p499_p12, %p649_p4 }
  0x1a   : > { %s437_s7 = sshll.u32 %s219_s6, 3  ;;  %s580_s6 = smov [#allocation3]  }
  0x1b   : > { %s225_s10 = scalar_lea.vmem %s727_s0, %s437_s7  ;;  %p501_p0 = pneg %p500_p13 }
  0x1c   : > { %v231_v3 = vld [vmem:[%s225_s10] sm:$0xff]  ;;  %s502_s7 = sshll.u32 %s580_s6, 4  ;;  %s503_s7 = int_to_ptr.vmem [resolvable:$false] %s502_s7 }
  0x1d   : > { %v238_v4 = vcombine.high %v231_v3, %v231_v3  ;;  %s504_s8 = scalar_lea.vmem %s503_s7, 512  ;;  %p505_p1 = scmp.lt.s32.totalorder %s682_s23, %s503_s7 }
  0x1e   : > { %p506_p2 = scmp.lt.s32.totalorder %s504_s8, %s498_s5 }
  0x1f   : > { %429 = vmatprep.subr.msk.mxu0 %vm243_vm0, %v238_v4 }
  0x20   : > { %430 = vmatpush1.msk.msra.mxu0 %vm243_vm0, %v231_v3  ;;  %p507_p3 = por %p506_p2, %p505_p1 }
  0x21   : > { %431 = vmatmul.mubr.msk.f32.vlgmr.msra.gmra.mrb[0].mxu0 %vm239_vm1, %v229_v5 }
  0x22   : > { %p508_p5 = pnand %p507_p3, %p501_p0 }
  0x91   : > { %v235_v6 = vpop.permute.xlu0 %234 }
  0xf4   : > { %v314_v7 = vpop.f32.mrb[0].mxu0 }
  0xf5   : > { %v315_v9 = vadd.f32 %v314_v7, %v235_v6  ;;  %v316_v10 = vpop.f32.mrb[1].mxu0 }
  0xf6   : > { %v317_v11 = vadd.f32 %v316_v10, %v235_v6 }
  0xf7   : > { %vm319_vm2 = vcmp.gt.f32.partialorder %v315_v9, 0.0  ;;  %v322_v12 = vmul.f32 %v321_v8, %v315_v9 }
  0xf8   : > { %vm320_vm3 = vcmp.gt.f32.partialorder %v317_v11, 0.0  ;;  %v323_v13 = vmul.f32 %v321_v8, %v317_v11 }
  0xf9   : > { %v324_v14 = vsel %vm319_vm2, %v315_v9, %v322_v12 }
  0xfa   : > { %v325_v15 = vsel %vm320_vm3, %v317_v11, %v323_v13  ;;  %326 = vst [vmem:[%s216_s3] sm:$0xff] %v324_v14 }
  0xfb   : > { %327 = vst [vmem:[%s216_s3 + $0x8] sm:$0xff] %v325_v15 }
  0xfc   : > { %511 = shalt.err (!%p508_p5)
}
  0xfd   : > { %s512_s9 = scalar_lea.hbm %s680_s30, 256  ;;  %s516_s12 = scalar_lea.hbm %s731_s4, 512 }
  0xfe   : > { %p513_p6 = scmp.ne.s32.totalorder %s680_s30, %s512_s9  ;;  %p517_p10 = scmp.lt.u32.totalorder %s680_s30, %s731_s4 }
  0xff   : > { %p518_p11 = scmp.lt.u32.totalorder %s516_s12, %s512_s9  ;;  %p520_p13 = scmp.lt.u32.totalorder %s512_s9, %s680_s30 }
 0x100   : > { %p514_p7 = pnand %p513_p6, %p649_p4 }
 0x101   : > { %p519_p12 = por %p518_p11, %p517_p10 }
 0x102   : > { %p515_p9 = pneg %p514_p7 }
 0x103   : > { %p521_p0 = por %p520_p13, %p519_p12 }
 0x105   : > { %p522_p1 = pnand %p521_p0, %p515_p9 }
 0x107   : > { %525 = shalt.err (!%p522_p1)
}
 0x108   : > { %439 = dma.vmem_to_hbm [thread:$0]  (%p649_p4), %s682_s23, 256, %s680_s30, %s329_s20  }
 0x109 PF: > { %p445_p2 = scmp.ge.s32.totalorder %s576_s22, 2  ;;  %s357_s15 = sand.u32 1, %s556_s17  }
 0x10a   : > { %s358_s16 = scalar_lea.sflag [#allocation4], %s357_s15 }
 0x10b   : > { %p442_p3 = pnand %p445_p2, %p656_p8 }
 0x10d   : > { %551 = dma.done.wait (!%p442_p3), %s358_s16, 256  }
 0x10e   : > { %553 = vsyncadd (!%p442_p3), %s358_s16, 4294967040  ;;  %s18_s22 = sadd.s32 1, %s576_s22   ;;  %s734_s17 = smov %s560_s18 }
 0x10f   : > { %p15_p5 = scmp.ge.s32.totalorder %s18_s22, 4   ;;  %s735_s18 = smov %s564_s19 }
 0x110   : > { %s736_s19 = smov %s662_s29  ;;  %s737_s20 = smov %s572_s21 }
 0x111   : > { %s738_s21 = smov %s740_s24  ;;  %17 = sbr.rel (!%p15_p5) target bundleno = 6 (0x6), region = 71 }
 0x118   :  { %363 = vsyncpa [#allocation4], 1 }
 0x119   :  { %365 = vsyncpa [#allocation4 + $0x1], 1 }

</bundles_post_ra>
